<compile_context>
chip_gen: v6e
topology: v6e:2x2x1
jax: 0.10.0
libtpu: 0.0.40
codegen_flags: <defaults>
</compile_context>

<pallas_src>
import functools

import jax
import jax.numpy as jnp
from jax.experimental import pallas as pl
from jax.experimental.pallas import tpu as pltpu


def _round_up(x, m):
    return (x + m - 1) // m * m


def _cdiv(a, b):
    return -(-a // b)


def _gelu_new(x):
    # transformers "gelu_new": 0.5*x*(1+tanh(sqrt(2/pi)*(x+0.044715*x^3)))
    c = 0.7978845608028654  # sqrt(2/pi)
    return 0.5 * x * (1.0 + jnp.tanh(c * (x + 0.044715 * (x * x * x))))


def _head_kernel(x_ref, w1_ref, b1_ref, w2_ref, b2_ref, o_ref):
    # x arrives f32 straight from HBM; cast to bf16 on the VPU so both matmuls
    # run at native MXU bf16 rate with f32 accumulation.
    x = x_ref[...].astype(jnp.bfloat16)                        # [B_TILE, H]
    h = jnp.dot(x, w1_ref[...], preferred_element_type=jnp.float32) + b1_ref[...]
    # hidden_act = "gelu_new" (BigBird default); f32 on VPU, tanh lands in the
    # EUP slot (effectively free next to the MXU work).
    h = _gelu_new(h)
    y = jnp.dot(h.astype(w2_ref.dtype), w2_ref[...],
                preferred_element_type=jnp.float32) + b2_ref[...]
    o_ref[...] = y.astype(o_ref.dtype)                         # lane-dense store (LP % 128 == 0)


def prepare_head_params(w_dense, b_dense, w_out, b_out):
    """One-time (model-load) param prep: transpose, bf16-cast, pad labels->128.

    w_dense: [H, H] (PyTorch [out, in]); w_out: [L, H]. Returns a pytree usable
    by bigbird_classification_head; no per-call transposes remain.
    """
    H = w_dense.shape[0]
    L = w_out.shape[0]
    LP = _round_up(L, 128)                                     # lane-dense output width
    w1 = jnp.asarray(w_dense).T.astype(jnp.bfloat16)           # [H, H]   (x @ W1)
    b1 = jnp.asarray(b_dense).reshape(1, H).astype(jnp.float32)
    w2 = jnp.zeros((H, LP), jnp.bfloat16).at[:, :L].set(
        jnp.asarray(w_out).T.astype(jnp.bfloat16))             # [H, LP]  (h @ W2)
    b2 = jnp.zeros((1, LP), jnp.float32).at[:, :L].set(
        jnp.asarray(b_out).reshape(1, L).astype(jnp.float32))
    return (w1, b1, w2, b2)


def _choose_batch_tile(B):
    """Pick the batch tile (static, from shapes)."""
    # Large tiles amortize the ~0.35 us per-grid-step overhead.
    b_tile = min(1024, _round_up(B, 16))
    n = _cdiv(B, b_tile)
    if n > 1 and n % 2 == 1:
        # Prefer an even number of grid steps so the "parallel" batch axis
        # splits evenly across v7x's two TensorCores.
        n += 1
        b_tile = _round_up(_cdiv(B, n), 16)
    return b_tile


@functools.partial(jax.jit, static_argnames=("num_labels",))
def bigbird_classification_head(features, params, *, num_labels):
    """features: [B, S, H]; params from prepare_head_params. Returns [B, num_labels] f32."""
    w1, b1, w2, b2 = params
    H = w1.shape[0]
    LP = w2.shape[1]
    B = features.shape[0]

    # CLS token slice only — no pre-cast, no pad at large B.
    x = features[:, 0, :]                                      # [B, H] f32
    b_tile = _choose_batch_tile(B)
    if B < b_tile:
        # Tiny batch: a single tile larger than the batch; pad (negligible copy).
        x = jnp.pad(x, ((0, b_tile - B), (0, 0)))
    rows = x.shape[0]          # padded rows (small B) or B (ragged last tile masked by Pallas)
    grid = (_cdiv(rows, b_tile),)

    rows_comp = grid[0] * b_tile
    cost = pl.CostEstimate(
        flops=2 * rows_comp * H * (H + LP),
        transcendentals=rows_comp * H,
        bytes_accessed=(rows * H * 4 + H * H * 2 + H * LP * 2
                        + H * 4 + LP * 4 + rows * LP * 4),
    )

    # Grid-invariant operands: single-buffered (no point double-buffering a
    # block whose index never changes — frees VMEM for the bigger batch tile).
    resident = dict(pipeline_mode=pl.Buffered(1))

    out = pl.pallas_call(
        _head_kernel,
        out_shape=jax.ShapeDtypeStruct((rows, LP), jnp.float32),
        grid=grid,
        in_specs=[
            pl.BlockSpec((b_tile, H), lambda i: (i, 0)),               # x tiles, pipelined
            pl.BlockSpec((H, H), lambda i: (0, 0), **resident),        # W1 resident
            pl.BlockSpec((1, H), lambda i: (0, 0), **resident),        # b1 resident
            pl.BlockSpec((H, LP), lambda i: (0, 0), **resident),       # W2 resident
            pl.BlockSpec((1, LP), lambda i: (0, 0), **resident),       # b2 resident
        ],
        out_specs=pl.BlockSpec((b_tile, LP), lambda i: (i, 0)),
        compiler_params=pltpu.CompilerParams(
            dimension_semantics=("parallel",),          # shard batch steps across TCs (v7x)
            vmem_limit_bytes=32 * 1024 * 1024,          # 1024-row f32 x tile fits v5e too
        ),
        cost_estimate=cost,
    )(x, w1, b1, w2, b2)

    return out[:B, :num_labels]


def _reference(features, w_dense, b_dense, w_out, b_out):
    x = features[:, 0, :]
    h = x @ w_dense.T + b_dense
    h = _gelu_new(h)
    return h @ w_out.T + b_out


if __name__ == "__main__":
    # config: hidden_size=32, num_labels=4; features [B=2, S=8, H=32]
    B, S, H, L = 2, 8, 32, 4
    key = jax.random.PRNGKey(0)
    k_feat, k_w1, k_b1, k_w2, k_b2 = jax.random.split(key, 5)

    features = jax.random.normal(k_feat, (B, S, H), dtype=jnp.float32)
    w_dense = jax.random.normal(k_w1, (H, H), dtype=jnp.float32) * 0.02
    b_dense = jax.random.normal(k_b1, (H,), dtype=jnp.float32) * 0.02
    w_out = jax.random.normal(k_w2, (L, H), dtype=jnp.float32) * 0.02
    b_out = jax.random.normal(k_b2, (L,), dtype=jnp.float32) * 0.02

    params = prepare_head_params(w_dense, b_dense, w_out, b_out)   # one-time prep
    out = bigbird_classification_head(features, params, num_labels=L)
    out = jax.block_until_ready(out)

    ref = _reference(features, w_dense, b_dense, w_out, b_out)
    assert out.shape == (B, L)
    # bf16 matmul operands (f32 accumulation) -> looser tolerance vs f32 reference.
    assert jnp.allclose(out, ref, atol=2e-2, rtol=2e-2), "mismatch vs reference"
    print("KERNEL_OK")
</pallas_src>

<mosaic_0001>
module attributes {stable_mosaic.version = 11 : i64} {
  func.func @_head_kernel(%arg0: i32, %arg1: memref<16x32xf32, #tpu.memory_space<vmem>>, %arg2: memref<32x32xbf16, #tpu.memory_space<vmem>>, %arg3: memref<1x32xf32, #tpu.memory_space<vmem>>, %arg4: memref<32x128xbf16, #tpu.memory_space<vmem>>, %arg5: memref<1x128xf32, #tpu.memory_space<vmem>>, %arg6: memref<16x128xf32, #tpu.memory_space<vmem>>) attributes {dimension_semantics = [#tpu.dimension_semantics<parallel>], iteration_bounds = array<i64: 1>, scalar_prefetch = 0 : i64, scratch_operands = 0 : i64, tpu.core_type = #tpu.core_type<tc>, window_params = [{transform_indices = @transform_0, window_bounds = array<i64: 16, 32>}, {pipeline_mode = #tpu.pipeline_mode<synchronous>, transform_indices = @transform_1, window_bounds = array<i64: 32, 32>}, {pipeline_mode = #tpu.pipeline_mode<synchronous>, transform_indices = @transform_2, window_bounds = array<i64: 1, 32>}, {pipeline_mode = #tpu.pipeline_mode<synchronous>, transform_indices = @transform_3, window_bounds = array<i64: 32, 128>}, {pipeline_mode = #tpu.pipeline_mode<synchronous>, transform_indices = @transform_4, window_bounds = array<i64: 1, 128>}, {transform_indices = @transform_5, window_bounds = array<i64: 16, 128>}]} {
    %c0 = arith.constant 0 : index
    %c0_0 = arith.constant 0 : index
    %0 = vector.load %arg1[%c0, %c0_0] : memref<16x32xf32, #tpu.memory_space<vmem>>, vector<16x32xf32>
    %1 = arith.truncf %0 : vector<16x32xf32> to vector<16x32xbf16>
    %c0_1 = arith.constant 0 : index
    %c0_2 = arith.constant 0 : index
    %2 = vector.load %arg2[%c0_1, %c0_2] : memref<32x32xbf16, #tpu.memory_space<vmem>>, vector<32x32xbf16>
    %cst = arith.constant dense<0.000000e+00> : vector<16x32xf32>
    %3 = tpu.matmul %1, %2, %cst {dimension_numbers = #tpu.dot_dimension_numbers<[1], [0], [0], [1], [0, 0, 1, 1], [], []>} : vector<16x32xbf16>, vector<32x32xbf16>, vector<16x32xf32> -> vector<16x32xf32>
    %c0_3 = arith.constant 0 : index
    %c0_4 = arith.constant 0 : index
    %4 = vector.load %arg3[%c0_3, %c0_4] : memref<1x32xf32, #tpu.memory_space<vmem>>, vector<1x32xf32>
    %5 = vector.broadcast %4 : vector<1x32xf32> to vector<16x32xf32>
    %6 = arith.addf %3, %5 : vector<16x32xf32>
    %cst_5 = arith.constant 5.000000e-01 : f32
    %7 = vector.broadcast %cst_5 : f32 to vector<16x32xf32>
    %8 = arith.mulf %7, %6 : vector<16x32xf32>
    %9 = arith.mulf %6, %6 : vector<16x32xf32>
    %10 = arith.mulf %9, %6 : vector<16x32xf32>
    %cst_6 = arith.constant 4.471500e-02 : f32
    %11 = vector.broadcast %cst_6 : f32 to vector<16x32xf32>
    %12 = arith.mulf %11, %10 : vector<16x32xf32>
    %13 = arith.addf %6, %12 : vector<16x32xf32>
    %cst_7 = arith.constant 0.797884583 : f32
    %14 = vector.broadcast %cst_7 : f32 to vector<16x32xf32>
    %15 = arith.mulf %14, %13 : vector<16x32xf32>
    %16 = math.tanh %15 : vector<16x32xf32>
    %cst_8 = arith.constant 1.000000e+00 : f32
    %17 = vector.broadcast %cst_8 : f32 to vector<16x32xf32>
    %18 = arith.addf %17, %16 : vector<16x32xf32>
    %19 = arith.mulf %8, %18 : vector<16x32xf32>
    %20 = arith.truncf %19 : vector<16x32xf32> to vector<16x32xbf16>
    %c0_9 = arith.constant 0 : index
    %c0_10 = arith.constant 0 : index
    %21 = vector.load %arg4[%c0_9, %c0_10] : memref<32x128xbf16, #tpu.memory_space<vmem>>, vector<32x128xbf16>
    %cst_11 = arith.constant dense<0.000000e+00> : vector<16x128xf32>
    %22 = tpu.matmul %20, %21, %cst_11 {dimension_numbers = #tpu.dot_dimension_numbers<[1], [0], [0], [1], [0, 0, 1, 1], [], []>} : vector<16x32xbf16>, vector<32x128xbf16>, vector<16x128xf32> -> vector<16x128xf32>
    %c0_12 = arith.constant 0 : index
    %c0_13 = arith.constant 0 : index
    %23 = vector.load %arg5[%c0_12, %c0_13] : memref<1x128xf32, #tpu.memory_space<vmem>>, vector<1x128xf32>
    %24 = vector.broadcast %23 : vector<1x128xf32> to vector<16x128xf32>
    %25 = arith.addf %22, %24 : vector<16x128xf32>
    %c0_14 = arith.constant 0 : index
    %c0_15 = arith.constant 0 : index
    %26 = vector.load %arg6[%c0_14, %c0_15] : memref<16x128xf32, #tpu.memory_space<vmem>>, vector<16x128xf32>
    tpu.vector_store %arg6[%c0_14, %c0_15], %25 {strides = array<i32>} : memref<16x128xf32, #tpu.memory_space<vmem>>, vector<16x128xf32>,
    return
  }
  func.func @transform_0(%arg0: i32) -> (i32, i32) {
    %c0_i32 = arith.constant 0 : i32
    %c0_i32_0 = arith.constant 0 : i32
    return %arg0, %c0_i32 : i32, i32
  }
  func.func @transform_1(%arg0: i32) -> (i32, i32) {
    %c0_i32 = arith.constant 0 : i32
    %c0_i32_0 = arith.constant 0 : i32
    %c0_i32_1 = arith.constant 0 : i32
    return %c0_i32, %c0_i32_0 : i32, i32
  }
  func.func @transform_2(%arg0: i32) -> (i32, i32) {
    %c0_i32 = arith.constant 0 : i32
    %c0_i32_0 = arith.constant 0 : i32
    %c0_i32_1 = arith.constant 0 : i32
    return %c0_i32, %c0_i32_0 : i32, i32
  }
  func.func @transform_3(%arg0: i32) -> (i32, i32) {
    %c0_i32 = arith.constant 0 : i32
    %c0_i32_0 = arith.constant 0 : i32
    %c0_i32_1 = arith.constant 0 : i32
    return %c0_i32, %c0_i32_0 : i32, i32
  }
  func.func @transform_4(%arg0: i32) -> (i32, i32) {
    %c0_i32 = arith.constant 0 : i32
    %c0_i32_0 = arith.constant 0 : i32
    %c0_i32_1 = arith.constant 0 : i32
    return %c0_i32, %c0_i32_0 : i32, i32
  }
  func.func @transform_5(%arg0: i32) -> (i32, i32) {
    %c0_i32 = arith.constant 0 : i32
    %c0_i32_0 = arith.constant 0 : i32
    return %arg0, %c0_i32 : i32, i32
  }
}

</mosaic_0001>

<bundles_post_ra>
// kernel: bigbird_classification_head.1
= control target key start
LH: loop header
LB: loop body
LE: loop exit
PB: predicated region body
PF: predicated region fallthrough
CT: control target
= control target key end

     0   :  { %10 = vsyncpa [#allocation3], 0  ;;  %s264_s18 = smov [#allocation2]   ;;  %s328_s0 = inlined_call_operand.vmem [shape: f32[16,32], index: 0, kind: input, shape index: {}]   ;;  %s329_s1 = inlined_call_operand.vmem [shape: bf16[32,32], index: 1, kind: input, shape index: {}]   ;;  %s330_s2 = inlined_call_operand.vmem [shape: f32[1,32], index: 2, kind: input, shape index: {}]   ;;  %s331_s3 = inlined_call_operand.hbm [shape: bf16[32,128], index: 3, kind: input, shape index: {}]   ;;  %s332_s4 = inlined_call_operand.vmem [shape: f32[1,128], index: 4, kind: input, shape index: {}]   ;;  %s333_s5 = inlined_call_operand.vmem [shape: f32[16,128], index: 5, kind: output, shape index: {}]  }
   0x1   :  { %s22_s19 = sshll.u32 %s264_s18, 4  ;;  %s23_s19 = int_to_ptr.vmem [resolvable:$true] %s22_s19 }
   0x2   :  { %s250_s20 = scalar_lea.vmem %s23_s19, 256  ;;  %p255_p1 = scmp.lt.s32.totalorder %s23_s19, %s23_s19 }
   0x3   :  { %p251_p0 = scmp.ne.s32.totalorder %s23_s19, %s250_s20  ;;  %p256_p2 = scmp.lt.s32.totalorder %s250_s20, %s250_s20 }
   0x5   :  { %p257_p3 = por %p256_p2, %p255_p1 }
   0x7   :  { %p258_p4 = pnand %p257_p3, %p251_p0 }
   0x9   :  { %261 = shalt.err (!%p258_p4)
}
   0xa   :  { %s265_s21 = smov 64   ;;  %s266_s22 = smov 4  }
   0xb   :  { %28 = dma.hbm_to_vmem [thread:$0]  %s331_s3, 256, %s23_s19, [#allocation3], %s265_s21, %s265_s21, %s266_s22  }
   0xc   :  { %262 = dma.done.wait [#allocation3], 256  }
   0xd   :  { %263 = vsyncadd [#allocation3], 4294967040  ;;  %v267_v0 = vmov 0.0   ;;  %vm268_vm0 = vmmov 0   ;;  %v234_v1 = vld [vmem:[%s329_s1 + $0x8] sm:$0xff]   ;;  %v235_v2 = vld [vmem:[%s329_s1] sm:$0xff]  }
   0xe   :  { %213 = vmatprep.subr.bf16.mxu0 %v267_v0  ;;  %217 = vmatprep.mubr.msk.bf16.mxu0 %vm268_vm0, %v267_v0  ;;  %v35_v3 = vld [vmem:[%s328_s0] sm:$0xff]  ;;  %v36_v4 = vld [vmem:[%s328_s0 + $0x8] sm:$0xff]  ;;  %vm61_vm1 = vcmask 261120  }
   0xf   :  { %221 = vmatprep.subr.bf16.mxu1 %v267_v0  ;;  %225 = vmatprep.mubr.msk.bf16.mxu1 %vm268_vm0, %v267_v0  ;;  %v37_v5 = vpack.c.bf16 %v36_v4, %v35_v3  ;;  %v236_v6 = vld [vmem:[#allocation2 + $0x8] sm:$0xff]   ;;  %v237_v7 = vld [vmem:[#allocation2] sm:$0xff]  }
  0x10   :  { %214 = vmatpush3.bf16.msra.mxu0 %v234_v1  ;;  %222 = vmatpush3.bf16.msra.mxu1 %v236_v6  ;;  %v199_v8 = vld [vmem:[%s330_s2] ss:$0 sm:$0xff] }
  0x11   :  { %215 = vmatprep.subr.bf16.mxu0 %v267_v0  ;;  %223 = vmatprep.subr.bf16.mxu1 %v267_v0  ;;  %v203_v34 = vld [vmem:[%s332_s4] ss:$0 sm:$0xff] }
  0x14   :  { %216 = vmatpush3.bf16.msra.mxu0 %v235_v2  ;;  %224 = vmatpush3.bf16.msra.mxu1 %v237_v7 }
  0x17   :  { %218 = vmatmul.mubr.msk.bf16.vlgmr.msra.gmra.mxu0 %vm61_vm1, %v37_v5 }
  0xd7   :  { %v99_v9 = vpop.f32.mrf.mxu0 }
  0xd8   :  { %v100_v10 = vadd.f32 %v199_v8, %v99_v9 }
  0xd9   :  { %v219_v11 = vpop.f32.mrf.mxu0 }
  0xda   :  { %v108_v12 = vmul.f32 %v100_v10, %v100_v10  ;;  %v106_v28 = vmul.f32 0.5, %v100_v10 }
  0xdb   :  { %v102_v13 = vpop.f32.mrf.mxu0 }
  0xdc   :  { %v110_v14 = vmul.f32 %v108_v12, %v100_v10  ;;  %v103_v15 = vadd.f32 %v199_v8, %v102_v13 }
  0xdd   :  { %v220_v16 = vpop.f32.mrf.mxu0 }
  0xde   :  { %v112_v17 = vmul.f32 0.044715, %v110_v14  ;;  %v109_v18 = vmul.f32 %v103_v15, %v103_v15  ;;  %v107_v29 = vmul.f32 0.5, %v103_v15 }
  0xe0   :  { %v114_v19 = vadd.f32 %v112_v17, %v100_v10  ;;  %v111_v20 = vmul.f32 %v109_v18, %v103_v15 }
  0xe2   :  { %v116_v21 = vmul.f32 0.7978846, %v114_v19  ;;  %v113_v22 = vmul.f32 0.044715, %v111_v20 }
  0xe4   :  { %238 = vtanh.f32 %v116_v21  ;;  %v115_v23 = vadd.f32 %v113_v22, %v103_v15 }
  0xe6   :  { %v117_v24 = vmul.f32 0.7978846, %v115_v23 }
  0xe8   :  { %240 = vtanh.f32 %v117_v24 }
  0xf1   :  { %v239_v25 = vpop.eup %238 }
  0xf2   :  { %v120_v26 = vadd.f32 1.0, %v239_v25 }
  0xf4   :  { %v122_v31 = vmul.f32 %v120_v26, %v106_v28 }
  0xf5   :  { %v241_v27 = vpop.eup %240 }
  0xf6   :  { %v121_v30 = vadd.f32 1.0, %v241_v27 }
  0xf8   :  { %v123_v32 = vmul.f32 %v121_v30, %v107_v29 }
  0xfa   :  { %v124_v33 = vpack.c.bf16 %v123_v32, %v122_v31 }
  0xfc   :  { %226 = vmatmul.mubr.msk.bf16.vlgmr.msra.gmra.mxu1 %vm61_vm1, %v124_v33 }
 0x1bc   :  { %v185_v35 = vpop.f32.mrf.mxu1 }
 0x1bd   :  { %v186_v36 = vadd.f32 %v203_v34, %v185_v35 }
 0x1be   :  { %v227_v37 = vpop.f32.mrf.mxu1 }
 0x1bf   :  { %192 = vst [vmem:[%s333_s5] sm:$0xff] %v186_v36 }
 0x1c0   :  { %v188_v38 = vpop.f32.mrf.mxu1 }
 0x1c1   :  { %v189_v39 = vadd.f32 %v203_v34, %v188_v38 }
 0x1c2   :  { %v228_v40 = vpop.f32.mrf.mxu1 }
 0x1c3   :  { %193 = vst [vmem:[%s333_s5 + $0x8] sm:$0xff] %v189_v39 }
 0x1c4   :  { %198 = vsyncpa [#allocation3], 1 }

</bundles_post_ra>
